<compile_context>
chip_gen: v7x
topology: tpu7x:2x2x1
jax: 0.10.0
libtpu: 0.0.40
codegen_flags: <defaults>
</compile_context>

<pallas_src>
import functools

import jax
import jax.numpy as jnp
from jax.experimental import pallas as pl
from jax.experimental.pallas import tpu as pltpu

_SUBLANE = 16          # block_b alignment; valid for f32 (8) and bf16 (16) packing
_VMEM_BUDGET = 20 << 20  # conservative vs. 32 MiB default scoped VMEM on all gens


def _cdiv(a, b):
    return (a + b - 1) // b


def _round_up(n, m):
    return _cdiv(n, m) * m


def _nnproba_kernel(x_ref, w1_ref, b1_ref, w2_ref, b2_ref, out_ref):
    # fc1 + ReLU.  Inputs may be bf16; accumulate on the MXU in f32.
    x = x_ref[...]
    h = jnp.dot(x, w1_ref[...], preferred_element_type=jnp.float32) + b1_ref[...]
    h = jnp.maximum(h, 0.0)

    # fc2 (logits), again streamed in the compute dtype, accumulated in f32.
    logits = (
        jnp.dot(h.astype(w2_ref.dtype), w2_ref[...],
                preferred_element_type=jnp.float32)
        + b2_ref[...]
    )

    # Numerically stable softmax / log_softmax along the last dim, in f32.
    m = jnp.max(logits, axis=-1, keepdims=True)
    shifted = logits - m
    e = jnp.exp(shifted)
    s = jnp.sum(e, axis=-1, keepdims=True)
    inv_s = pl.reciprocal(s, approx=True)   # EUP slot; VPU stays free
    probs = e * inv_s
    log_probs = shifted - jnp.log(s)        # exact path for log_softmax

    # Single stacked store: [softmax | log_softmax] -> one (block_b, 2*D) tile.
    out_ref[...] = jnp.concatenate([probs, log_probs], axis=-1).astype(out_ref.dtype)


def _pick_block_b(batch, requested, input_dim, h_dim, output_dim,
                  in_itemsize, out_itemsize):
    bb = max(_SUBLANE, min(requested, _round_up(batch, _SUBLANE)))
    # Keep at least 2 parallel grid steps when the batch allows, so v7x's two
    # TensorCores can both be used (no effect on single-TC v5e/v6e).
    if batch >= 2 * _SUBLANE and _cdiv(batch, bb) < 2:
        bb = _round_up(_cdiv(batch, 2), _SUBLANE)

    def vmem_bytes(b):
        tiles = 2 * b * input_dim * in_itemsize + 2 * b * 2 * output_dim * out_itemsize
        weights = 2 * ((input_dim * h_dim + h_dim * output_dim) * in_itemsize
                       + (h_dim + output_dim) * 4)
        return tiles + weights

    # Clamp so double-buffered tiles + resident weights fit well under the
    # default scoped VMEM limit (also safe on v7x's 64 MiB physical VMEM).
    while vmem_bytes(bb) > _VMEM_BUDGET and bb > _SUBLANE:
        bb = max(_SUBLANE, _round_up(bb // 2, _SUBLANE))
    return bb


@functools.partial(jax.jit, static_argnames=("block_b", "compute_dtype"))
def nnproba_forward(x, w1, b1, w2, b2, *, block_b=512, compute_dtype=jnp.bfloat16):
    """Returns (softmax(logits), log_softmax(logits)) like NNProba.forward."""
    batch, input_dim = x.shape
    h_dim = w1.shape[1]
    output_dim = w2.shape[1]
    out_dtype = x.dtype

    in_itemsize = jnp.dtype(compute_dtype).itemsize
    out_itemsize = jnp.dtype(out_dtype).itemsize
    bb = _pick_block_b(batch, block_b, input_dim, h_dim, output_dim,
                       in_itemsize, out_itemsize)

    padded = _round_up(batch, bb)
    if padded != batch:
        x = jnp.pad(x, ((0, padded - batch), (0, 0)))
    grid = (padded // bb,)

    # Stream x / weights in the compute dtype; biases stay f32 (added post-MXU).
    xc = x.astype(compute_dtype)
    w1c = w1.astype(compute_dtype)
    w2c = w2.astype(compute_dtype)
    b1_2d = b1.reshape(1, h_dim).astype(jnp.float32)
    b2_2d = b2.reshape(1, output_dim).astype(jnp.float32)

    flops = 2 * padded * (input_dim * h_dim + h_dim * output_dim)
    bytes_accessed = (
        padded * input_dim * in_itemsize
        + (input_dim * h_dim + h_dim * output_dim) * in_itemsize
        + (h_dim + output_dim) * 4
        + padded * 2 * output_dim * out_itemsize
    )
    cost = pl.CostEstimate(flops=flops,
                           transcendentals=padded * output_dim,
                           bytes_accessed=bytes_accessed)

    stacked = pl.pallas_call(
        _nnproba_kernel,
        out_shape=jax.ShapeDtypeStruct((padded, 2 * output_dim), out_dtype),
        grid_spec=pltpu.PrefetchScalarGridSpec(
            num_scalar_prefetch=0,
            grid=grid,
            in_specs=[
                pl.BlockSpec((bb, input_dim), lambda i: (i, 0)),     # x tile
                pl.BlockSpec((input_dim, h_dim), lambda i: (0, 0)),  # W1 (resident)
                pl.BlockSpec((1, h_dim), lambda i: (0, 0)),          # b1
                pl.BlockSpec((h_dim, output_dim), lambda i: (0, 0)), # W2 (resident)
                pl.BlockSpec((1, output_dim), lambda i: (0, 0)),     # b2
            ],
            out_specs=pl.BlockSpec((bb, 2 * output_dim), lambda i: (i, 0)),
        ),
        compiler_params=pltpu.CompilerParams(
            dimension_semantics=("parallel",),
        ),
        cost_estimate=cost,
    )(xc, w1c, b1_2d, w2c, b2_2d)

    probs = stacked[:batch, :output_dim]
    log_probs = stacked[:batch, output_dim:]
    return probs, log_probs


def init_nnproba_params(key, input_dim, output_dim, h_dim=16, dtype=jnp.float32):
    """Deterministic init matching torch.nn.Linear's U(-1/sqrt(fan_in), 1/sqrt(fan_in))."""
    k1, k2, k3, k4 = jax.random.split(key, 4)
    bound1 = 1.0 / jnp.sqrt(float(input_dim))
    bound2 = 1.0 / jnp.sqrt(float(h_dim))
    # Stored as (in, out) == transpose of torch's (out, in).
    w1 = jax.random.uniform(k1, (input_dim, h_dim), dtype, -bound1, bound1)
    b1 = jax.random.uniform(k2, (h_dim,), dtype, -bound1, bound1)
    w2 = jax.random.uniform(k3, (h_dim, output_dim), dtype, -bound2, bound2)
    b2 = jax.random.uniform(k4, (output_dim,), dtype, -bound2, bound2)
    return w1, b1, w2, b2


if __name__ == "__main__":
    input_dim, h_dim, output_dim = 32, 16, 8

    key = jax.random.PRNGKey(0)
    kx1, kx2, kp = jax.random.split(key, 3)
    w1, b1, w2, b2 = init_nnproba_params(kp, input_dim, output_dim, h_dim)

    def reference(x):
        h = jnp.maximum(x @ w1 + b1, 0.0)
        logits = h @ w2 + b2
        return jax.nn.softmax(logits, axis=-1), jax.nn.log_softmax(logits, axis=-1)

    # 1) f32 streaming path: tight check of the kernel math.
    x1 = jax.random.normal(kx1, (64, input_dim), jnp.float32)
    p1, lp1 = nnproba_forward(x1, w1, b1, w2, b2, block_b=32,
                              compute_dtype=jnp.float32)
    jax.block_until_ready((p1, lp1))
    p1_ref, lp1_ref = reference(x1)
    assert p1.shape == (64, output_dim) and lp1.shape == (64, output_dim)
    assert jnp.allclose(lp1, lp1_ref, atol=1e-4), "log_softmax mismatch (f32)"
    assert jnp.allclose(p1, p1_ref, atol=3e-3), "softmax mismatch (f32, approx recip)"

    # 2) Default perf config: bf16 streaming, large tiles, ragged batch (padding path).
    x2 = jax.random.normal(kx2, (200, input_dim), jnp.float32)
    p2, lp2 = nnproba_forward(x2, w1, b1, w2, b2)
    jax.block_until_ready((p2, lp2))
    p2_ref, lp2_ref = reference(x2)
    assert p2.shape == (200, output_dim) and lp2.shape == (200, output_dim)
    assert jnp.allclose(p2, p2_ref, atol=5e-2), "softmax mismatch (bf16)"
    assert jnp.allclose(lp2, lp2_ref, atol=1e-1), "log_softmax mismatch (bf16)"

    print("KERNEL_OK")
</pallas_src>

<mosaic_0001>
module attributes {stable_mosaic.version = 11 : i64} {
  func.func @_nnproba_kernel(%arg0: i32, %arg1: memref<32x32xf32, #tpu.memory_space<vmem>>, %arg2: memref<32x16xf32, #tpu.memory_space<vmem>>, %arg3: memref<1x16xf32, #tpu.memory_space<vmem>>, %arg4: memref<16x8xf32, #tpu.memory_space<vmem>>, %arg5: memref<1x8xf32, #tpu.memory_space<vmem>>, %arg6: memref<32x16xf32, #tpu.memory_space<vmem>>) attributes {dimension_semantics = [#tpu.dimension_semantics<parallel>], iteration_bounds = array<i64: 2>, scalar_prefetch = 0 : i64, scratch_operands = 0 : i64, tpu.core_type = #tpu.core_type<tc>, window_params = [{transform_indices = @transform_0, window_bounds = array<i64: 32, 32>}, {pipeline_mode = #tpu.pipeline_mode<synchronous>, transform_indices = @transform_1, window_bounds = array<i64: 32, 16>}, {pipeline_mode = #tpu.pipeline_mode<synchronous>, transform_indices = @transform_2, window_bounds = array<i64: 1, 16>}, {pipeline_mode = #tpu.pipeline_mode<synchronous>, transform_indices = @transform_3, window_bounds = array<i64: 16, 8>}, {pipeline_mode = #tpu.pipeline_mode<synchronous>, transform_indices = @transform_4, window_bounds = array<i64: 1, 8>}, {transform_indices = @transform_5, window_bounds = array<i64: 32, 16>}]} {
    %c0 = arith.constant 0 : index
    %c0_0 = arith.constant 0 : index
    %0 = vector.load %arg1[%c0, %c0_0] : memref<32x32xf32, #tpu.memory_space<vmem>>, vector<32x32xf32>
    %c0_1 = arith.constant 0 : index
    %c0_2 = arith.constant 0 : index
    %1 = vector.load %arg2[%c0_1, %c0_2] : memref<32x16xf32, #tpu.memory_space<vmem>>, vector<32x16xf32>
    %cst = arith.constant dense<0.000000e+00> : vector<32x16xf32>
    %2 = tpu.matmul %0, %1, %cst {dimension_numbers = #tpu.dot_dimension_numbers<[1], [0], [0], [1], [0, 0, 1, 1], [], []>} : vector<32x32xf32>, vector<32x16xf32>, vector<32x16xf32> -> vector<32x16xf32>
    %c0_3 = arith.constant 0 : index
    %c0_4 = arith.constant 0 : index
    %3 = vector.load %arg3[%c0_3, %c0_4] : memref<1x16xf32, #tpu.memory_space<vmem>>, vector<1x16xf32>
    %4 = vector.broadcast %3 : vector<1x16xf32> to vector<32x16xf32>
    %5 = arith.addf %2, %4 : vector<32x16xf32>
    %cst_5 = arith.constant 0.000000e+00 : f32
    %6 = vector.broadcast %cst_5 : f32 to vector<32x16xf32>
    %7 = arith.maximumf %5, %6 : vector<32x16xf32>
    %c0_6 = arith.constant 0 : index
    %c0_7 = arith.constant 0 : index
    %8 = vector.load %arg4[%c0_6, %c0_7] : memref<16x8xf32, #tpu.memory_space<vmem>>, vector<16x8xf32>
    %cst_8 = arith.constant dense<0.000000e+00> : vector<32x8xf32>
    %9 = tpu.matmul %7, %8, %cst_8 {dimension_numbers = #tpu.dot_dimension_numbers<[1], [0], [0], [1], [0, 0, 1, 1], [], []>} : vector<32x16xf32>, vector<16x8xf32>, vector<32x8xf32> -> vector<32x8xf32>
    %c0_9 = arith.constant 0 : index
    %c0_10 = arith.constant 0 : index
    %10 = vector.load %arg5[%c0_9, %c0_10] : memref<1x8xf32, #tpu.memory_space<vmem>>, vector<1x8xf32>
    %11 = vector.broadcast %10 : vector<1x8xf32> to vector<32x8xf32>
    %12 = arith.addf %9, %11 : vector<32x8xf32>
    %cst_11 = arith.constant dense<0xFF800000> : vector<32xf32>
    %13 = vector.multi_reduction <maximumf>, %12, %cst_11 [1] : vector<32x8xf32> to vector<32xf32>
    %14 = vector.shape_cast %13 : vector<32xf32> to vector<32x1xf32>
    %15 = vector.broadcast %14 : vector<32x1xf32> to vector<32x8xf32>
    %16 = arith.subf %12, %15 : vector<32x8xf32>
    %17 = math.exp %16 : vector<32x8xf32>
    %cst_12 = arith.constant dense<0.000000e+00> : vector<32xf32>
    %18 = vector.multi_reduction <add>, %17, %cst_12 [1] : vector<32x8xf32> to vector<32xf32>
    %19 = vector.shape_cast %18 : vector<32xf32> to vector<32x1xf32>
    %20 = tpu.reciprocal %19 {approx = true} : vector<32x1xf32> -> vector<32x1xf32>
    %21 = vector.broadcast %20 : vector<32x1xf32> to vector<32x8xf32>
    %22 = arith.mulf %17, %21 : vector<32x8xf32>
    %23 = math.log %19 : vector<32x1xf32>
    %24 = vector.broadcast %23 : vector<32x1xf32> to vector<32x8xf32>
    %25 = arith.subf %16, %24 : vector<32x8xf32>
    %26 = tpu.concatenate %22, %25 in 1 : vector<32x8xf32>, vector<32x8xf32> -> vector<32x16xf32>
    %c0_13 = arith.constant 0 : index
    %c0_14 = arith.constant 0 : index
    %27 = vector.load %arg6[%c0_13, %c0_14] : memref<32x16xf32, #tpu.memory_space<vmem>>, vector<32x16xf32>
    tpu.vector_store %arg6[%c0_13, %c0_14], %26 {strides = array<i32>} : memref<32x16xf32, #tpu.memory_space<vmem>>, vector<32x16xf32>,
    return
  }
  func.func @transform_0(%arg0: i32) -> (i32, i32) {
    %c0_i32 = arith.constant 0 : i32
    %c0_i32_0 = arith.constant 0 : i32
    return %arg0, %c0_i32 : i32, i32
  }
  func.func @transform_1(%arg0: i32) -> (i32, i32) {
    %c0_i32 = arith.constant 0 : i32
    %c0_i32_0 = arith.constant 0 : i32
    %c0_i32_1 = arith.constant 0 : i32
    return %c0_i32, %c0_i32_0 : i32, i32
  }
  func.func @transform_2(%arg0: i32) -> (i32, i32) {
    %c0_i32 = arith.constant 0 : i32
    %c0_i32_0 = arith.constant 0 : i32
    %c0_i32_1 = arith.constant 0 : i32
    return %c0_i32, %c0_i32_0 : i32, i32
  }
  func.func @transform_3(%arg0: i32) -> (i32, i32) {
    %c0_i32 = arith.constant 0 : i32
    %c0_i32_0 = arith.constant 0 : i32
    %c0_i32_1 = arith.constant 0 : i32
    return %c0_i32, %c0_i32_0 : i32, i32
  }
  func.func @transform_4(%arg0: i32) -> (i32, i32) {
    %c0_i32 = arith.constant 0 : i32
    %c0_i32_0 = arith.constant 0 : i32
    %c0_i32_1 = arith.constant 0 : i32
    return %c0_i32, %c0_i32_0 : i32, i32
  }
  func.func @transform_5(%arg0: i32) -> (i32, i32) {
    %c0_i32 = arith.constant 0 : i32
    %c0_i32_0 = arith.constant 0 : i32
    return %arg0, %c0_i32 : i32, i32
  }
}

</mosaic_0001>

<bundles_post_ra>
// kernel: nnproba_forward.1
= control target key start
LH: loop header
LB: loop body
LE: loop exit
PB: predicated region body
PF: predicated region fallthrough
CT: control target
= control target key end

     0   :  { %s732_s18 = smov 0   ;;  %s800_s0 = inlined_call_operand.vmem [shape: f32[64,32], index: 0, kind: input, shape index: {}]   ;;  %s801_s1 = inlined_call_operand.vmem [shape: f32[32,16], index: 1, kind: input, shape index: {}]   ;;  %s802_s2 = inlined_call_operand.vmem [shape: f32[1,16], index: 2, kind: input, shape index: {}]   ;;  %s803_s3 = inlined_call_operand.vmem [shape: f32[16,8], index: 3, kind: input, shape index: {}]   ;;  %s804_s4 = inlined_call_operand.vmem [shape: f32[1,8], index: 4, kind: input, shape index: {}]   ;;  %s805_s5 = inlined_call_operand.vmem [shape: f32[64,16], index: 5, kind: output, shape index: {}]  }
   0x1 LB: > { %s589_s19 = sadd.s32 4294967295, %s699_s18   ;;  %p593_p0 = scmp.ge.s32.totalorder %s699_s18, 1  ;;  %s699_s18 = sphi %s732_s18, %s15_s18  }
   0x2   : > { %p188_p1 = scmp.lt.s32.totalorder %s699_s18, 3 }
   0x4   : > { %p189_p2 = pnand %p593_p0, %p188_p1 }
   0x5   : > { %v232_v0 = vld [vmem:[%s801_s1] sm:$0xff] (!%p189_p2)  ;;  %v233_v1 = vld [vmem:[%s801_s1 + $0x8] sm:$0xff] (!%p189_p2)  ;;  %v234_v2 = vld [vmem:[%s801_s1 + $0x10] sm:$0xff] (!%p189_p2)  ;;  %s594_s26 = sshll.u32 (!%p189_p2), %s589_s19, 2  ;;  %vm243_vm0 = vcmask (!%p189_p2), 261120   ;;  %vm354_vm1 = vcmask (!%p189_p2), 130048  }
   0x6   : > { %192 = sbr.rel (%p189_p2) target bundleno = 897 (0x381), region = 40  ;;  %v648_v3 = vpack.c.bf16 (!%p189_p2), %v233_v1, %v232_v0  ;;  %v235_v4 = vld [vmem:[%s801_s1 + $0x18] sm:$0xff] (!%p189_p2)  ;;  %p217_p3 = scmp.lt.s32.totalorder (!%p189_p2), %s594_s26, 7  ;;  %v345_v10 = vld [vmem:[%s803_s3] sm:$0xff] (!%p189_p2)  ;;  %v346_v11 = vld [vmem:[%s803_s3 + $0x8] sm:$0xff] (!%p189_p2)  ;;  %vm452_vm2 = vcmask (!%p189_p2), 64512  }
   0x7   : > { %v652_v5 = vpack.c.bf16 (!%p189_p2), %v235_v4, %v234_v2  ;;  %v656_v12 = vpack.c.bf16 (!%p189_p2), %v346_v11, %v345_v10  ;;  %v598_v13 = vld [vmem:[%s802_s2] ss:$0 sm:$0xff] (!%p189_p2)  ;;  %s701_s16 = smov (!%p189_p2), 8  }
   0x8   : > { %649 = vmatprep.subr.bf16.mxu0 (!%p189_p2), %v648_v3  ;;  %v603_v26 = vld [vmem:[%s804_s4] ss:$0 sm:$0xff] (!%p189_p2) }
   0x9   : > { %651 = vmatpush3.bf16.msra.mxu0 (!%p189_p2), %v648_v3  ;;  %657 = vmatprep.subr.bf16.mxu1 (!%p189_p2), %v656_v12 }
   0xa   : > { %653 = vmatprep.subr.bf16.mxu0 (!%p189_p2), %v652_v5  ;;  %659 = vmatpush3.bf16.msra.mxu1 (!%p189_p2), %v656_v12 }
   0xd   : > { %s807_s26 = smov (!%p217_p3, %s594_s26), 7  ;;  %655 = vmatpush3.bf16.msra.mxu0 %v652_v5 }
   0xe   : > { %s595_s29 = sshll.u32 %s807_s26, 3 }
   0xf   : > { %s220_s7 = scalar_lea.vmem %s800_s0, %s595_s29  ;;  %s226_s20 = scalar_lea.vmem %s805_s5, %s595_s29 }
  0x10   : > { %v228_v6 = vld [vmem:[%s220_s7] sm:$0xff]  ;;  %v229_v7 = vld [vmem:[%s220_s7 + $0x8] sm:$0xff]  ;;  %v230_v8 = vld [vmem:[%s220_s7 + $0x10] sm:$0xff] }
  0x11   : > { %632 = vmatprep.mubr.msk.f32.mxu0 %vm243_vm0, %v228_v6  ;;  %v231_v9 = vld [vmem:[%s220_s7 + $0x18] sm:$0xff] }
  0x12   : > { %633 = vmatmul.mubr.msk.f32.vlgmr.msra.gmra.mrb[0].mxu0 %vm243_vm0, %v229_v7 }
  0x13   : > { %635 = vmatprep.mubr.msk.f32.mxu0 %vm243_vm0, %v230_v8 }
  0x16   : > { %636 = vmatmul.mubr.msk.f32.gmra.mrb[2].mxu0 %vm243_vm0, %v231_v9 }
  0xe5   : > { %v634_v14 = vpop.f32.mrb[0].mxu0 }
  0xe6   : > { %v328_v15 = vadd.f32 %v634_v14, %v598_v13  ;;  %v322_v16 = vpop.f32.mrb[1].mxu0 }
  0xe7   : > { %v323_v17 = vadd.f32 %v598_v13, %v322_v16 }
  0xe8   : > { %v342_v20 = vmax.f32 %v328_v15, 0.0 }
  0xe9   : > { %v341_v18 = vmax.f32 %v323_v17, 0.0  ;;  %v637_v19 = vpop.f32.mrb[2].mxu0 }
  0xea   : > { %v338_v21 = vadd.f32 %v637_v19, %v598_v13  ;;  %v332_v22 = vpop.f32.mrb[3].mxu0 }
  0xeb   : > { %v333_v23 = vadd.f32 %v598_v13, %v332_v22  ;;  %642 = vmatprep.mubr.msk.f32.mxu1 %vm354_vm1, %v341_v18 }
  0xec   : > { %v344_v24 = vmax.f32 %v338_v21, 0.0  ;;  %643 = vmatmul.mubr.msk.f32.vlgmr.msra.gmra.mrb[0].mxu1 %vm354_vm1, %v342_v20 }
  0xed   : > { %v343_v25 = vmax.f32 %v333_v23, 0.0 }
  0xef   : > { %645 = vmatprep.mubr.msk.f32.mxu1 %vm354_vm1, %v343_v25 }
  0xf0   : > { %646 = vmatmul.mubr.msk.f32.gmra.mrb[2].mxu1 %vm354_vm1, %v344_v24 }
 0x1bf   : > { %v644_v27 = vpop.f32.mrb[0].mxu1 }
 0x1c0   : > { %v433_v28 = vpop.f32.mrb[1].mxu1  ;;  %v439_v30 = vadd.f32 %v644_v27, %v603_v26 }
 0x1c1   : > { %v434_v29 = vadd.f32 %v603_v26, %v433_v28 }
 0x1c2   : > { %v456_v37 = vsel %vm452_vm2, %v439_v30, -inf }
 0x1c3   : > { %v647_v31 = vpop.f32.mrb[2].mxu1  ;;  %v453_v32 = vsel %vm452_vm2, %v434_v29, -inf }
 0x1c4   : > { %v443_v33 = vpop.f32.mrb[3].mxu1  ;;  %454 = vmax.xlane.f32.xlu0 %v453_v32  ;;  %v449_v35 = vadd.f32 %v647_v31, %v603_v26 }
 0x1c5   : > { %v444_v34 = vadd.f32 %v603_v26, %v443_v33 }
 0x1c6   : > { %v462_v38 = vsel %vm452_vm2, %v449_v35, -inf }
 0x1c7   : > { %v459_v36 = vsel %vm452_vm2, %v444_v34, -inf }
 0x1c8   : > { %460 = vmax.xlane.f32.xlu1 %v459_v36  ;;  %457 = vmax.xlane.f32.xlu0 %v456_v37 }
 0x1cc   : > { %463 = vmax.xlane.f32.xlu1 %v462_v38 }
 0x251   : > { %v455_v39 = vpop.xlane.xlu0 %454 }
 0x252   : > { %v465_v40 = vsub.f32 %v434_v29, %v455_v39 }
 0x254   : > { %v469_v41 = vmul.f32 1.442695, %v465_v40 }
 0x255   : > { %v461_v42 = vpop.xlane.xlu1 %460  ;;  %v458_v43 = vpop.xlane.xlu0 %457 }
 0x256   : > { %669 = vpow2.f32 %v469_v41  ;;  %v467_v44 = vsub.f32 %v444_v34, %v461_v42  ;;  %v466_v45 = vsub.f32 %v439_v30, %v458_v43 }
 0x258   : > { %v473_v46 = vmul.f32 1.442695, %v467_v44  ;;  %v471_v47 = vmul.f32 1.442695, %v466_v45 }
 0x259   : > { %v464_v48 = vpop.xlane.xlu1 %463 }
 0x25a   : > { %671 = vpow2.f32 %v473_v46  ;;  %v468_v49 = vsub.f32 %v449_v35, %v464_v48 }
 0x25b   : > { %673 = vpow2.f32 %v471_v47 }
 0x25c   : > { %v475_v50 = vmul.f32 1.442695, %v468_v49 }
 0x25e   : > { %675 = vpow2.f32 %v475_v50 }
 0x260   : > { %v670_v51 = vpop.eup %669 }
 0x261   : > { %v477_v52 = vsel %vm452_vm2, %v670_v51, 0.0 }
 0x262   : > { %478 = vadd.xlane.f32.xlu0 %v477_v52 }
 0x264   : > { %v672_v53 = vpop.eup %671 }
 0x265   : > { %v674_v54 = vpop.eup %673  ;;  %v483_v55 = vsel %vm452_vm2, %v672_v53, 0.0 }
 0x266   : > { %484 = vadd.xlane.f32.xlu0 %v483_v55  ;;  %v480_v56 = vsel %vm452_vm2, %v674_v54, 0.0 }
 0x267   : > { %481 = vadd.xlane.f32.xlu1 %v480_v56 }
 0x268   : > { %v676_v57 = vpop.eup %675 }
 0x269   : > { %v486_v58 = vsel %vm452_vm2, %v676_v57, 0.0 }
 0x26b   : > { %487 = vadd.xlane.f32.xlu1 %v486_v58 }
 0x2ef   : > { %v479_v59 = vpop.xlane.xlu0 %478 }
 0x2f0   : > { %677 = vlog2.f32 %v479_v59 }
 0x2f3   : > { %v485_v61 = vpop.xlane.xlu0 %484 }
 0x2f4   : > { %v482_v60 = vpop.xlane.xlu1 %481 }
 0x2f5   : > { %679 = vlog2.f32 %v482_v60 }
 0x2f6   : > { %681 = vlog2.f32 %v485_v61 }
 0x2f8   : > { %v488_v62 = vpop.xlane.xlu1 %487 }
 0x2f9   : > { %683 = vlog2.f32 %v488_v62 }
 0x2fa   : > { %v678_v63 = vpop.eup %677  ;;  %685 = vrcp.f32 %v479_v59 }
 0x2fb   : > { %v498_v0 = vmul.f32 0.6931472, %v678_v63  ;;  %687 = vrcp.f32 %v482_v60 }
 0x2fc   : > { %689 = vrcp.f32 %v485_v61 }
 0x2fd   : > { %v505_v1 = vsub.f32 %v465_v40, %v498_v0  ;;  %691 = vrcp.f32 %v488_v62 }
 0x2ff   : > { %v680_v2 = vpop.eup %679  ;;  %513 = vrot.lane.b32.xlu0 %v505_v1, %s701_s16 }
 0x300   : > { %v682_v3 = vpop.eup %681  ;;  %v500_v4 = vmul.f32 0.6931472, %v680_v2 }
 0x301   : > { %v502_v5 = vmul.f32 0.6931472, %v682_v3 }
 0x302   : > { %v506_v6 = vsub.f32 %v466_v45, %v500_v4 }
 0x303   : > { %v684_v7 = vpop.eup %683  ;;  %v507_v9 = vsub.f32 %v467_v44, %v502_v5 }
 0x304   : > { %515 = vrot.lane.b32.xlu1 %v506_v6, %s701_s16  ;;  %v504_v8 = vmul.f32 0.6931472, %v684_v7  ;;  %v686_v11 = vpop.eup %685 }
 0x305   : > { %v493_v12 = vmul.f32 %v686_v11, %v670_v51  ;;  %v688_v14 = vpop.eup %687 }
 0x306   : > { %v508_v10 = vsub.f32 %v468_v49, %v504_v8  ;;  %v494_v16 = vmul.f32 %v688_v14, %v674_v54  ;;  %v690_v17 = vpop.eup %689 }
 0x307   : > { %v495_v20 = vmul.f32 %v690_v17, %v672_v53  ;;  %v692_v21 = vpop.eup %691 }
 0x308   : > { %517 = vrot.lane.b32.xlu1 %v507_v9, %s701_s16  ;;  %v496_v24 = vmul.f32 %v692_v21, %v676_v57 }
 0x30c   : > { %519 = vrot.lane.b32.xlu1 %v508_v10, %s701_s16 }
 0x371   : > { %v514_v13 = vpop.permute.xlu0 %513 }
 0x372   : > { %v525_v15 = vsel %vm452_vm2, %v493_v12, %v514_v13 }
 0x373   : > { %529 = vst.msk [vmem:[%s226_s20] sm:$0xff] %vm354_vm1, %v525_v15 }
 0x376   : > { %v516_v18 = vpop.permute.xlu1 %515 }
 0x377   : > { %v526_v19 = vsel %vm452_vm2, %v494_v16, %v516_v18 }
 0x378   : > { %530 = vst.msk [vmem:[%s226_s20 + $0x8] sm:$0xff] %vm354_vm1, %v526_v19 }
 0x37a   : > { %v518_v22 = vpop.permute.xlu1 %517 }
 0x37b   : > { %v527_v23 = vsel %vm452_vm2, %v495_v20, %v518_v22 }
 0x37c   : > { %531 = vst.msk [vmem:[%s226_s20 + $0x10] sm:$0xff] %vm354_vm1, %v527_v23 }
 0x37e   : > { %v520_v25 = vpop.permute.xlu1 %519 }
 0x37f   : > { %v528_v26 = vsel %vm452_vm2, %v496_v24, %v520_v25 }
 0x380   : > { %532 = vst.msk [vmem:[%s226_s20 + $0x18] sm:$0xff] %vm354_vm1, %v528_v26 }
 0x381 PF: > { %s15_s18 = sadd.s32 1, %s699_s18  }
 0x382   : > { %p12_p4 = scmp.ge.s32.totalorder %s15_s18, 4  }
 0x384   :  { %14 = sbr.rel (!%p12_p4) target bundleno = 1 (0x1), region = 70 }

</bundles_post_ra>
